<compile_context>
chip_gen: v7x
topology: tpu7x:2x2x1
jax: 0.10.0
libtpu: 0.0.40
codegen_flags: <defaults>
</compile_context>

<pallas_src>
import functools

import jax
import jax.numpy as jnp
from jax.experimental import pallas as pl
from jax.experimental.pallas import tpu as pltpu


def _se_kernel(x_ref, w1_ref, w2_ref, o_ref, *, inv_hw):
    """One grid step: Bt batch elements, full (packed) spatial x channel tile.

    x_ref / o_ref : (Bt, HWp, Cp)   channels-last activations (lane axis = Cp)
    w1_ref        : (Cr, Cp)        fc1.weight tiled over the `pack` lane groups
    w2_ref        : (Cr, Cp)        fc2.weight.T tiled over the `pack` lane groups
    """
    # ---- squeeze: spatial sum with f32 accumulation (sublane reduce). Each lane group
    # holds a partial mean; the tiled-weight lane reduce below sums the groups.
    y = jnp.sum(x_ref[...].astype(jnp.float32), axis=1) * inv_hw        # (Bt, Cp)

    # ---- excitation: two tiny per-batch GEMVs on the VPU/XLU (kept off the MXU).
    h = jnp.sum(w1_ref[...] * y[:, None, :], axis=-1)                   # (Bt, Cr) lane reduce
    h = jnp.maximum(h, 0.0)
    s = jnp.sum(w2_ref[...] * h[:, :, None], axis=1)                    # (Bt, Cp) sublane reduce
    s = jax.nn.sigmoid(s).astype(o_ref.dtype)

    # ---- scale: re-read x in its native dtype (no live f32 copy of the full tile),
    # broadcast the per-channel gate over the spatial axis; lane-dense store.
    o_ref[...] = x_ref[...] * s[:, None, :]


def _choose_bt(batch, hw_p, c_p, itemsize, *,
               max_bt=8, tile_budget_bytes=20 * 1024 * 1024):
    """Largest batch block s.t. double-buffered (in + out) tiles fit the VMEM budget,
    preferring to keep >= 2 grid steps so both v7x TensorCores get work."""
    per_sample = hw_p * c_p * itemsize
    cap = max(1, int(tile_budget_bytes // (4 * per_sample)))   # 2 buffers x (in + out)
    cap = min(cap, max_bt, batch)
    best = 1
    for d in range(1, cap + 1):
        if batch % d == 0:
            best = d
    if best == batch and batch > 1:
        # keep at least 2 grid steps so dimension_semantics=("parallel",) has work to split
        for d in range(best - 1, 0, -1):
            if batch % d == 0:
                best = d
                break
    return best


def se_scale_nhwc(x_bhwc, w1, w2t):
    """SE layer on channels-last input.

    x_bhwc: (B, H, W, C) activations (f32 or bf16).
    w1    : (Cr, C)  = fc1.weight    (torch nn.Linear(C, C//r, bias=False).weight)
    w2t   : (Cr, C)  = fc2.weight.T  (torch nn.Linear(C//r, C, bias=False).weight.T)
    Returns x * sigmoid(relu(mean_hw(x) @ W1.T) @ W2.T), shape (B, H, W, C).
    """
    B, H, W, C = x_bhwc.shape
    HW = H * W
    Cr = w1.shape[0]

    # Lane packing: fold `pack` consecutive spatial positions into the lane axis when
    # C < 128 so the memory-bound scale uses full-width (unmasked) vector loads/stores.
    pack = 1
    if C < 128 and 128 % C == 0 and HW % (128 // C) == 0:
        pack = 128 // C
    HWp = HW // pack
    Cp = C * pack

    x3 = x_bhwc.reshape(B, HWp, Cp)
    if pack > 1:
        w1_p = jnp.tile(w1.astype(jnp.float32), (1, pack))
        w2_p = jnp.tile(w2t.astype(jnp.float32), (1, pack))
    else:
        w1_p = w1.astype(jnp.float32)
        w2_p = w2t.astype(jnp.float32)

    itemsize = jnp.dtype(x_bhwc.dtype).itemsize
    bt = _choose_bt(B, HWp, Cp, itemsize)

    cost = pl.CostEstimate(
        flops=2 * B * HW * C + 4 * B * C * Cr,      # squeeze-add + scale-mul + 2 GEMVs
        transcendentals=B * C,                       # sigmoid
        bytes_accessed=2 * B * HW * C * itemsize + 2 * Cr * Cp * 4,
    )

    out3 = pl.pallas_call(
        functools.partial(_se_kernel, inv_hw=1.0 / HW),
        out_shape=jax.ShapeDtypeStruct((B, HWp, Cp), x_bhwc.dtype),
        grid_spec=pltpu.PrefetchScalarGridSpec(
            num_scalar_prefetch=0,
            grid=(B // bt,),
            in_specs=[
                pl.BlockSpec((bt, HWp, Cp), lambda b: (b, 0, 0)),   # batch-blocked tile
                pl.BlockSpec((Cr, Cp), lambda b: (0, 0)),           # weights stay resident
                pl.BlockSpec((Cr, Cp), lambda b: (0, 0)),
            ],
            out_specs=pl.BlockSpec((bt, HWp, Cp), lambda b: (b, 0, 0)),
        ),
        compiler_params=pltpu.CompilerParams(
            dimension_semantics=("parallel",),      # batch-block loop: megacore-shardable
            vmem_limit_bytes=32 * 1024 * 1024,      # fits scoped VMEM on v5e/v6e/v7x
        ),
        cost_estimate=cost,
    )(x3, w1_p, w2_p)

    return out3.reshape(B, H, W, C)


def se_layer(x_nchw, w1, w2t):
    """PyTorch-layout convenience wrapper: x (B, C, H, W) -> (B, C, H, W).

    The NCHW<->NHWC transposes are layout plumbing at the XLA boundary; in a real
    TPU SE-ResNet the activations would already be channels-last.
    """
    out = se_scale_nhwc(jnp.transpose(x_nchw, (0, 2, 3, 1)), w1, w2t)
    return jnp.transpose(out, (0, 3, 1, 2))


def se_layer_ref(x_nchw, w1, w2t):
    """Pure-JAX reference mirroring the PyTorch SELayer.forward (bias-free FCs)."""
    y = jnp.mean(x_nchw, axis=(2, 3))                  # (B, C)
    h = jnp.maximum(y @ w1.T, 0.0)                     # (B, Cr)   y @ W1.T
    s = jax.nn.sigmoid(h @ w2t)                        # (B, C)    h @ W2.T
    return x_nchw * s[:, :, None, None]


if __name__ == "__main__":
    key = jax.random.PRNGKey(0)
    reduction = 16

    # Case 1: first SE stage shape (C=64) -> lane-packing (pack=2) path, grid of 2 steps.
    B, C, H, W = 2, 64, 8, 8
    Cr = C // reduction
    kx, k1, k2, key = jax.random.split(key, 4)
    x = jax.random.normal(kx, (B, C, H, W), dtype=jnp.float32)
    w1 = jax.random.normal(k1, (Cr, C), dtype=jnp.float32) * 0.1     # fc1.weight
    w2t = jax.random.normal(k2, (Cr, C), dtype=jnp.float32) * 0.1    # fc2.weight.T

    out = jax.block_until_ready(se_layer(x, w1, w2t))
    ref = se_layer_ref(x, w1, w2t)
    assert out.shape == (B, C, H, W)
    assert jnp.allclose(out, ref, atol=1e-4, rtol=1e-4)

    # Case 2: second SE stage shape (C=128) -> pack=1, batch-blocked (Bt=2, grid=2).
    B2, C2, H2, W2 = 4, 128, 4, 4
    Cr2 = C2 // reduction
    kx2, k3, k4, key = jax.random.split(key, 4)
    x2 = jax.random.normal(kx2, (B2, C2, H2, W2), dtype=jnp.float32)
    w1b = jax.random.normal(k3, (Cr2, C2), dtype=jnp.float32) * 0.1
    w2tb = jax.random.normal(k4, (Cr2, C2), dtype=jnp.float32) * 0.1

    out2 = jax.block_until_ready(se_layer(x2, w1b, w2tb))
    ref2 = se_layer_ref(x2, w1b, w2tb)
    assert out2.shape == (B2, C2, H2, W2)
    assert jnp.allclose(out2, ref2, atol=1e-4, rtol=1e-4)

    # Case 3: bf16 activation I/O (halved HBM bytes; f32 squeeze/excitation inside).
    x3 = x2.astype(jnp.bfloat16)
    out3 = jax.block_until_ready(se_layer(x3, w1b, w2tb))
    ref3 = se_layer_ref(x3.astype(jnp.float32), w1b, w2tb)
    assert jnp.allclose(out3.astype(jnp.float32), ref3, atol=5e-2, rtol=5e-2)

    print("KERNEL_OK")
</pallas_src>

<mosaic_0001>
module attributes {stable_mosaic.version = 11 : i64} {
  func.func @_se_kernel(%arg0: i32, %arg1: memref<1x32x128xf32, #tpu.memory_space<vmem>>, %arg2: memref<4x128xf32, #tpu.memory_space<vmem>>, %arg3: memref<4x128xf32, #tpu.memory_space<vmem>>, %arg4: memref<1x32x128xf32, #tpu.memory_space<vmem>>) attributes {dimension_semantics = [#tpu.dimension_semantics<parallel>], iteration_bounds = array<i64: 2>, scalar_prefetch = 0 : i64, scratch_operands = 0 : i64, tpu.core_type = #tpu.core_type<tc>, window_params = [{transform_indices = @transform_0, window_bounds = array<i64: 1, 32, 128>}, {pipeline_mode = #tpu.pipeline_mode<synchronous>, transform_indices = @transform_1, window_bounds = array<i64: 4, 128>}, {pipeline_mode = #tpu.pipeline_mode<synchronous>, transform_indices = @transform_2, window_bounds = array<i64: 4, 128>}, {transform_indices = @transform_3, window_bounds = array<i64: 1, 32, 128>}]} {
    %c0 = arith.constant 0 : index
    %c0_0 = arith.constant 0 : index
    %c0_1 = arith.constant 0 : index
    %0 = vector.load %arg1[%c0, %c0_0, %c0_1] : memref<1x32x128xf32, #tpu.memory_space<vmem>>, vector<1x32x128xf32>
    %cst = arith.constant dense<0.000000e+00> : vector<1x128xf32>
    %1 = vector.multi_reduction <add>, %0, %cst [1] : vector<1x32x128xf32> to vector<1x128xf32>
    %cst_2 = arith.constant 1.562500e-02 : f32
    %2 = vector.broadcast %cst_2 : f32 to vector<1x128xf32>
    %3 = arith.mulf %1, %2 : vector<1x128xf32>
    %c0_3 = arith.constant 0 : index
    %c0_4 = arith.constant 0 : index
    %4 = vector.load %arg2[%c0_3, %c0_4] : memref<4x128xf32, #tpu.memory_space<vmem>>, vector<4x128xf32>
    %5 = vector.shape_cast %3 : vector<1x128xf32> to vector<1x1x128xf32>
    %6 = vector.shape_cast %4 : vector<4x128xf32> to vector<1x4x128xf32>
    %7 = vector.broadcast %5 : vector<1x1x128xf32> to vector<1x4x128xf32>
    %8 = arith.mulf %6, %7 : vector<1x4x128xf32>
    %cst_5 = arith.constant dense<0.000000e+00> : vector<1x4xf32>
    %9 = vector.multi_reduction <add>, %8, %cst_5 [2] : vector<1x4x128xf32> to vector<1x4xf32>
    %cst_6 = arith.constant 0.000000e+00 : f32
    %10 = vector.broadcast %cst_6 : f32 to vector<1x4xf32>
    %11 = arith.maximumf %9, %10 : vector<1x4xf32>
    %c0_7 = arith.constant 0 : index
    %c0_8 = arith.constant 0 : index
    %12 = vector.load %arg3[%c0_7, %c0_8] : memref<4x128xf32, #tpu.memory_space<vmem>>, vector<4x128xf32>
    %13 = vector.shape_cast %11 : vector<1x4xf32> to vector<1x4x1xf32>
    %14 = vector.shape_cast %12 : vector<4x128xf32> to vector<1x4x128xf32>
    %15 = vector.broadcast %13 : vector<1x4x1xf32> to vector<1x4x128xf32>
    %16 = arith.mulf %14, %15 : vector<1x4x128xf32>
    %cst_9 = arith.constant dense<0.000000e+00> : vector<1x128xf32>
    %17 = vector.multi_reduction <add>, %16, %cst_9 [1] : vector<1x4x128xf32> to vector<1x128xf32>
    %18 = arith.negf %17 : vector<1x128xf32>
    %19 = math.exp %18 : vector<1x128xf32>
    %cst_10 = arith.constant 1.000000e+00 : f32
    %20 = vector.broadcast %cst_10 : f32 to vector<1x128xf32>
    %21 = arith.addf %20, %19 : vector<1x128xf32>
    %22 = arith.divf %20, %21 : vector<1x128xf32>
    %c0_11 = arith.constant 0 : index
    %c0_12 = arith.constant 0 : index
    %c0_13 = arith.constant 0 : index
    %23 = vector.load %arg1[%c0_11, %c0_12, %c0_13] : memref<1x32x128xf32, #tpu.memory_space<vmem>>, vector<1x32x128xf32>
    %24 = vector.shape_cast %22 : vector<1x128xf32> to vector<1x1x128xf32>
    %25 = vector.broadcast %24 : vector<1x1x128xf32> to vector<1x32x128xf32>
    %26 = arith.mulf %23, %25 : vector<1x32x128xf32>
    %c0_14 = arith.constant 0 : index
    %c0_15 = arith.constant 0 : index
    %c0_16 = arith.constant 0 : index
    %27 = vector.load %arg4[%c0_14, %c0_15, %c0_16] : memref<1x32x128xf32, #tpu.memory_space<vmem>>, vector<1x32x128xf32>
    tpu.vector_store %arg4[%c0_14, %c0_15, %c0_16], %26 {strides = array<i32>} : memref<1x32x128xf32, #tpu.memory_space<vmem>>, vector<1x32x128xf32>,
    return
  }
  func.func @transform_0(%arg0: i32) -> (i32, i32, i32) {
    %c0_i32 = arith.constant 0 : i32
    %c0_i32_0 = arith.constant 0 : i32
    %c0_i32_1 = arith.constant 0 : i32
    return %arg0, %c0_i32, %c0_i32_0 : i32, i32, i32
  }
  func.func @transform_1(%arg0: i32) -> (i32, i32) {
    %c0_i32 = arith.constant 0 : i32
    %c0_i32_0 = arith.constant 0 : i32
    %c0_i32_1 = arith.constant 0 : i32
    return %c0_i32, %c0_i32_0 : i32, i32
  }
  func.func @transform_2(%arg0: i32) -> (i32, i32) {
    %c0_i32 = arith.constant 0 : i32
    %c0_i32_0 = arith.constant 0 : i32
    %c0_i32_1 = arith.constant 0 : i32
    return %c0_i32, %c0_i32_0 : i32, i32
  }
  func.func @transform_3(%arg0: i32) -> (i32, i32, i32) {
    %c0_i32 = arith.constant 0 : i32
    %c0_i32_0 = arith.constant 0 : i32
    %c0_i32_1 = arith.constant 0 : i32
    return %arg0, %c0_i32, %c0_i32_0 : i32, i32, i32
  }
}

</mosaic_0001>

<bundles_post_ra>
// kernel: tpu_custom_call.1
= control target key start
LH: loop header
LB: loop body
LE: loop exit
PB: predicated region body
PF: predicated region fallthrough
CT: control target
= control target key end

     0   :  { %8 = vsyncpa [#allocation3], 0  ;;  %s789_s0 = inlined_call_operand.hbm [shape: f32[2,32,128], index: 0, kind: input, shape index: {}]   ;;  %s790_s1 = inlined_call_operand.hbm [shape: f32[4,128], index: 1, kind: input, shape index: {}]   ;;  %s791_s2 = inlined_call_operand.vmem [shape: f32[4,128], index: 2, kind: input, shape index: {}]   ;;  %s792_s3 = inlined_call_operand.hbm [shape: f32[2,32,128], index: 3, kind: output, shape index: {}]  }
   0x1   :  { %10 = vsyncpa [#allocation3 + $0x1], 0 }
   0x2   :  { %11 = vsyncpa [#allocation6], 0 }
   0x3   :  { %12 = vsyncpa [#allocation4], 0 }
   0x4   :  { %14 = vsyncpa [#allocation4 + $0x1], 0  ;;  %s584_s12 = smov 0   ;;  %s586_s13 = smov 0  }
   0x5   :  { %s588_s14 = smov 0   ;;  %s590_s15 = smov 0  }
   0x6 LB: > { %s605_s16 = sadd.s32 4294967295, %s555_s15   ;;  %s343_s17 = sadd.s32 4294967294, %s555_s15   ;;  %s555_s15 = sphi %s590_s15, %s817_s15   ;;  %s551_s14 = sphi %s588_s14, %s816_s14   ;;  %s547_s13 = sphi %s586_s13, %s815_s13   ;;  %s543_s12 = sphi %s584_s12, %s814_s12  }
   0x7   : > { %s609_s18 = sadd.s32 1, %s555_s15   ;;  %s27_s19 = sadd.s32 1, %s551_s14 }
   0x8   : > { %s24_s20 = ssub.s32 %s555_s15, %s609_s18  ;;  %p34_p0 = scmp.ne.s32.totalorder %s551_s14, %s547_s13 }
   0x9   : > { %p25_p1 = scmp.eq.s32.totalorder %s24_s20, 0  ;;  %p35_p2 = scmp.eq.s32.totalorder %s555_s15, 0 }
   0xa   : > { %p40_p3 = scmp.ne.s32.totalorder %s547_s13, %s543_s12  ;;  %p793_p4 = scmp.eq.s32.totalorder %s605_s16, 0 }
   0xb   : > { %s621_s21 = scalar_select %p25_p1, %s551_s14, %s27_s19  }
   0xc   : > { %p623_p5 = por %p35_p2, %p34_p0  ;;  %p629_p6 = por %p793_p4, %p40_p3 }
   0xd   : > { %p106_p7 = scmp.eq.s32.totalorder %s605_s16, 1  ;;  %p112_p8 = scmp.eq.s32.totalorder %s343_s17, 1 }
   0xe   : > { %s799_s23 = scalar_select %p629_p6, 1, 0 }
   0xf   : > { %p344_p9 = scmp.ge.s32.totalorder %s555_s15, 1  ;;  %p119_p10 = scmp.lt.s32.totalorder %s555_s15, 3 }
  0x10   : > { %p636_p11 = por %p106_p7, %p34_p0  ;;  %p640_p12 = por %p112_p8, %p40_p3 }
  0x11   : > { %p644_p13 = pnand %p344_p9, %p119_p10  ;;  %s557_s27 = smov [#allocation5]  }
  0x12   : > { %s800_s24 = scalar_select %p636_p11, 1, 0 }
  0x13   : > { %s801_s25 = scalar_select %p640_p12, 1, 0 }
  0x14   : > { %s802_s26 = scalar_select %p644_p13, 1, 0 }
  0x15   : > { %p370_p2 = pneg %p644_p13  ;;  %s132_s28 = sshll.u32 %s557_s27, 4  ;;  %s133_s28 = int_to_ptr.vmem [resolvable:$true] %s132_s28 }
  0x16   : > { %p383_p4 = scmp.lt.s32.totalorder %s555_s15, 2  ;;  %p803_p0 = scmp.eq.s32.totalorder %s605_s16, 0 }
  0x17   : > { %s146_s30 = sand.u32 1, %s551_s14   ;;  %s427_s8 = scalar_lea.hbm %s790_s1, 64 }
  0x18   : > { %p654_p7 = pnand %p370_p2, %p803_p0  ;;  %p661_p3 = pnand %p383_p4, %p623_p5 }
  0x19   : > { %s347_s5 = sshll.u32 %s146_s30, 5  ;;  %p428_p8 = scmp.ne.s32.totalorder %s790_s1, %s427_s8 }
  0x1a   : > { %s805_s4 = scalar_select %p661_p3, 1, 0 }
  0x1b   : > { %p429_p9 = pneg %p654_p7  ;;  %p434_p4 = scmp.lt.u32.totalorder %s427_s8, %s790_s1 }
  0x1d   : > { %p430_p10 = pnand %p429_p9, %p428_p8 }
  0x1f   : > { %p431_p2 = pneg %p430_p10 }
  0x21   : > { %p436_p5 = pnand %p434_p4, %p431_p2 }
  0x23   : > { %439 = shalt.err (!%p436_p5)
}
  0x24   : > { %s440_s19 = scalar_lea.vmem %s133_s28, 64  ;;  %p448_p11 = scmp.lt.s32.totalorder %s133_s28, %s133_s28 }
  0x25   : > { %p441_p0 = scmp.ne.s32.totalorder %s133_s28, %s440_s19  ;;  %p449_p6 = scmp.lt.s32.totalorder %s440_s19, %s440_s19 }
  0x27   : > { %p443_p1 = pnand %p441_p0, %p429_p9  ;;  %p450_p13 = por %p449_p6, %p448_p11 }
  0x29   : > { %p444_p12 = pneg %p443_p1 }
  0x2b   : > { %p451_p3 = pnand %p450_p13, %p444_p12 }
  0x2d   : > { %454 = shalt.err (!%p451_p3)
}
  0x2e   : > { %373 = dma.hbm_to_vmem [thread:$0]  (!%p654_p7), %s790_s1, 64, %s133_s28, [#allocation6]  }
  0x2f   : > { %s360_s27 = sshll.u32 %s555_s15, 9  ;;  %s150_s6 = scalar_lea.vmem [#allocation2], %s347_s5 }
  0x30   : > { %s157_s7 = sshll.u32 %s150_s6, 4  ;;  %s685_s10 = scalar_lea.hbm %s789_s0, %s360_s27  ;;  %s687_s7 = int_to_ptr.vmem [resolvable:$true] %s157_s7 }
  0x31   : > { %s689_s29 = scalar_lea.sflag [#allocation3], %s146_s30  ;;  %s455_s11 = scalar_lea.hbm %s685_s10, 512 }
  0x32   : > { %p456_p6 = scmp.ne.s32.totalorder %s685_s10, %s455_s11  ;;  %p806_p11 = scmp.ne.s32.totalorder %s805_s4, 0 }
  0x33   : > { %s460_s17 = scalar_lea.hbm %s789_s0, 1024  ;;  %p461_p7 = scmp.lt.u32.totalorder %s685_s10, %s789_s0 }
  0x34   : > { %p457_p12 = pneg %p806_p11  ;;  %p462_p3 = scmp.lt.u32.totalorder %s460_s17, %s455_s11 }
  0x35   : > { %p464_p9 = scmp.lt.u32.totalorder %s455_s11, %s685_s10 }
  0x36   : > { %p458_p13 = pnand %p457_p12, %p456_p6  ;;  %p463_p8 = por %p462_p3, %p461_p7 }
  0x38   : > { %p459_p1 = pneg %p458_p13  ;;  %p465_p10 = por %p464_p9, %p463_p8 }
  0x3a   : > { %p466_p2 = pnand %p465_p10, %p459_p1 }
  0x3c   : > { %469 = shalt.err (!%p466_p2)
}
  0x3d   : > { %s470_s30 = scalar_lea.vmem %s687_s7, 512  ;;  %s558_s22 = smov [#allocation2]  }
  0x3e   : > { %p471_p4 = scmp.ne.s32.totalorder %s687_s7, %s470_s30  ;;  %s475_s27 = sshll.u32 %s558_s22, 4  ;;  %s476_s27 = int_to_ptr.vmem [resolvable:$false] %s475_s27 }
  0x3f   : > { %s477_s6 = scalar_lea.vmem %s476_s27, 1024  ;;  %p478_p6 = scmp.lt.s32.totalorder %s687_s7, %s476_s27 }
  0x40   : > { %p473_p5 = pnand %p471_p4, %p457_p12  ;;  %p479_p13 = scmp.lt.s32.totalorder %s477_s6, %s470_s30 }
  0x42   : > { %p474_p0 = pneg %p473_p5  ;;  %p480_p7 = por %p479_p13, %p478_p6 }
  0x44   : > { %p481_p3 = pnand %p480_p7, %p474_p0 }
  0x46   : > { %484 = shalt.err (!%p481_p3)
}
  0x47   : > { %s559_s8 = smov 128   ;;  %s560_s9 = smov 8  }
  0x48   : > { %377 = dma.hbm_to_vmem [thread:$0]  (!%p806_p11), %s685_s10, 512, %s687_s7, %s689_s29, %s559_s8, %s559_s8, %s560_s9  }
  0x49   : > { %p807_p12 = scmp.ne.s32.totalorder %s802_s26, 0 }
  0x4a   : > { %s720_s11 = sand.u32 (!%p807_p12), 1, %s547_s13   ;;  %p808_p1 = scmp.ne.s32.totalorder (!%p807_p12), %s799_s23, 0 }
  0x4b   : > { %169 = sbr.rel (%p807_p12) target bundleno = 313 (0x139), region = 32  ;;  %s351_s28 = sshll.u32 (!%p807_p12), %s720_s11, 5 }
  0x4c   : > { %s172_s5 = scalar_lea.sflag (!%p807_p12), [#allocation3], %s720_s11  ;;  %s175_s17 = scalar_lea.vmem (!%p807_p12), [#allocation2], %s351_s28 }
  0x52   : > { %530 = dma.done.wait (%p808_p1), %s172_s5, 512  }
  0x53   : > { %532 = vsyncadd (%p808_p1), %s172_s5, 4294966784  ;;  %p809_p11 = scmp.eq.s32.totalorder %s605_s16, 0 }
  0x55   : > { %534 = dma.done.wait (%p809_p11), [#allocation6], 64   ;;  %p810_p8 = pmov %p809_p11 }
  0x56   : > { %v202_v0 = vld [vmem:[%s175_s17] sm:$0xff]  ;;  %v203_v1 = vld [vmem:[%s175_s17 + $0x8] sm:$0xff]  ;;  %v204_v2 = vld [vmem:[%s175_s17 + $0x10] sm:$0xff]  ;;  %vm218_vm0 = vcmask 1043456   ;;  %s361_s4 = sshll.u32 %s605_s16, 9  ;;  %s201_s7 = scalar_lea.vmem [#allocation7], %s351_s28 }
  0x57   : > { %536 = vsyncadd (%p810_p8), [#allocation6], 4294967232  ;;  %v206_v3 = vadd.f32 %v203_v1, %v202_v0  ;;  %v205_v4 = vld [vmem:[%s175_s17 + $0x18] sm:$0xff]  ;;  %v216_v13 = vld [vmem:[#allocation5] sm:$0xf]  ;;  %s260_s10 = sshll.u32 %s201_s7, 4  ;;  %s743_s20 = scalar_lea.hbm %s792_s3, %s361_s4  ;;  %s745_s10 = int_to_ptr.vmem [resolvable:$true] %s260_s10 }
  0x58   : > { %v223_v18 = vld [vmem:[%s791_s2] sm:$0xf]  ;;  %s247_s16 = scalar_lea.sflag [#allocation4], %s720_s11  ;;  %s485_s30 = scalar_lea.vmem %s745_s10, 512 }
  0x59   : > { %v207_v5 = vadd.f32 %v206_v3, %v204_v2  ;;  %p486_p9 = scmp.ne.s32.totalorder %s745_s10, %s485_s30  ;;  %p811_p10 = scmp.ne.s32.totalorder %s800_s24, 0 }
  0x5a   : > { %s561_s22 = smov [#allocation7]  }
  0x5b   : > { %v208_v6 = vadd.f32 %v207_v5, %v205_v4  ;;  %p487_p2 = pnand %p486_p9, %p811_p10  ;;  %s489_s27 = sshll.u32 %s561_s22, 4  ;;  %s490_s27 = int_to_ptr.vmem [resolvable:$false] %s489_s27 }
  0x5c   : > { %s491_s6 = scalar_lea.vmem %s490_s27, 1024  ;;  %p492_p5 = scmp.lt.s32.totalorder %s745_s10, %s490_s27 }
  0x5d   : > { %v209_v7 = vrot.slane %v208_v6, 4  ;;  %p488_p4 = pneg %p487_p2  ;;  %p493_p0 = scmp.lt.s32.totalorder %s491_s6, %s485_s30 }
  0x5f   : > { %v210_v8 = vadd.f32 %v209_v7, %v208_v6  ;;  %p494_p6 = por %p493_p0, %p492_p5 }
  0x61   : > { %v211_v9 = vrot.slane %v210_v8, 2  ;;  %p495_p13 = pnand %p494_p6, %p488_p4 }
  0x63   : > { %v212_v10 = vadd.f32 %v211_v9, %v210_v8 }
  0x65   : > { %v213_v11 = vrot.slane %v212_v10, 1 }
  0x67   : > { %v214_v12 = vadd.f32 %v213_v11, %v212_v10 }
  0x69   : > { %v215_v14 = vmul.f32 0.015625, %v214_v12 }
  0x6b   : > { %v217_v15 = vmul.f32 %v216_v13, %v215_v14 }
  0x6d   : > { %v219_v16 = vsel %vm218_vm0, %v217_v15, 0.0 }
  0x6e   : > { %220 = vadd.xlane.f32.xlu0 %v219_v16 }
  0xfb   : > { %v221_v17 = vpop.xlane.xlu0 %220 }
  0xfc   : > { %v222_v19 = vmax.f32 %v221_v17, 0.0 }
  0xfe   : > { %v224_v20 = vmul.f32 %v223_v18, %v222_v19 }
 0x100   : > { %v225_v21 = vsel %vm218_vm0, %v224_v20, 0.0 }
 0x101   : > { %v226_v22 = vrot.slane %v225_v21, 4 }
 0x103   : > { %v227_v23 = vadd.f32 %v226_v22, %v225_v21 }
 0x105   : > { %v228_v24 = vrot.slane %v227_v23, 2 }
 0x107   : > { %v229_v25 = vadd.f32 %v228_v24, %v227_v23 }
 0x109   : > { %v230_v26 = vrot.slane %v229_v25, 1 }
 0x10b   : > { %v231_v27 = vadd.f32 %v230_v26, %v229_v25 }
 0x10d   : > { %v354_v28 = vmul.f32 -1.442695, %v231_v27 }
 0x10f   : > { %423 = vpow2.f32 %v354_v28 }
 0x119   : > { %v424_v29 = vpop.eup %423 }
 0x11a   : > { %v235_v30 = vadd.f32 1.0, %v424_v29 }
 0x11c   : > { %425 = vrcp.f32 %v235_v30 }
 0x126   : > { %v426_v31 = vpop.eup %425 }
 0x127   : > { %v238_v32 = vmul.f32 %v426_v31, %v202_v0  ;;  %v239_v33 = vmul.f32 %v426_v31, %v203_v1  ;;  %v240_v34 = vmul.f32 %v426_v31, %v204_v2  ;;  %v241_v35 = vmul.f32 %v426_v31, %v205_v4 }
 0x129   : > { %242 = vst [vmem:[%s201_s7] sm:$0xff] %v238_v32  ;;  %243 = vst [vmem:[%s201_s7 + $0x8] sm:$0xff] %v239_v33 }
 0x12a   : > { %244 = vst [vmem:[%s201_s7 + $0x10] sm:$0xff] %v240_v34  ;;  %245 = vst [vmem:[%s201_s7 + $0x18] sm:$0xff] %v241_v35 }
 0x12b   : > { %498 = shalt.err (!%p495_p13)
}
 0x12c   : > { %s499_s8 = scalar_lea.hbm %s743_s20, 512  ;;  %s503_s5 = scalar_lea.hbm %s792_s3, 1024 }
 0x12d   : > { %p500_p7 = scmp.ne.s32.totalorder %s743_s20, %s499_s8  ;;  %p504_p1 = scmp.lt.u32.totalorder %s743_s20, %s792_s3 }
 0x12e   : > { %p505_p11 = scmp.lt.u32.totalorder %s503_s5, %s499_s8  ;;  %p507_p9 = scmp.lt.u32.totalorder %s499_s8, %s743_s20 }
 0x12f   : > { %p501_p3 = pnand %p500_p7, %p811_p10 }
 0x130   : > { %p506_p8 = por %p505_p11, %p504_p1 }
 0x131   : > { %p502_p12 = pneg %p501_p3 }
 0x132   : > { %p508_p2 = por %p507_p9, %p506_p8 }
 0x134   : > { %p509_p4 = pnand %p508_p2, %p502_p12 }
 0x136   : > { %512 = shalt.err (!%p509_p4)
}
 0x137   : > { %s562_s26 = smov 128   ;;  %s563_s4 = smov 8  }
 0x138   : > { %368 = dma.vmem_to_hbm [thread:$0]  (%p811_p10), %s745_s10, 512, %s743_s20, %s247_s16, %s562_s26, %s562_s26, %s563_s4  }
 0x139 PF: > { %s275_s7 = sand.u32 1, %s543_s12   ;;  %p812_p5 = scmp.ne.s32.totalorder %s801_s25, 0 }
 0x13a   : > { %p813_p0 = scmp.ge.s32.totalorder %s555_s15, 2  ;;  %s276_s29 = scalar_lea.sflag [#allocation4], %s275_s7 }
 0x13c   : > { %p379_p6 = pnand %p813_p0, %p812_p5 }
 0x13e   : > { %538 = dma.done.wait (!%p379_p6), %s276_s29, 512  }
 0x13f   : > { %540 = vsyncadd (!%p379_p6), %s276_s29, 4294966784  ;;  %p17_p13 = scmp.ge.s32.totalorder %s609_s18, 4   ;;  %s814_s12 = smov %s547_s13 }
 0x140   : > { %s815_s13 = smov %s551_s14  ;;  %s816_s14 = smov %s621_s21 }
 0x141   : > { %s817_s15 = smov %s609_s18  ;;  %19 = sbr.rel (!%p17_p13) target bundleno = 6 (0x6), region = 81 }
 0x148   :  { %281 = vsyncpa [#allocation3], 1 }
 0x149   :  { %283 = vsyncpa [#allocation3 + $0x1], 1 }
 0x14a   :  { %284 = vsyncpa [#allocation6], 1 }
 0x14b   :  { %285 = vsyncpa [#allocation4], 1 }
 0x14c   :  { %287 = vsyncpa [#allocation4 + $0x1], 1 }

</bundles_post_ra>
